<compile_context>
chip_gen: v6e
topology: v6e:2x2x1
jax: 0.10.0
libtpu: 0.0.40
codegen_flags: <defaults>
</compile_context>

<pallas_src>
import jax
import jax.numpy as jnp
import numpy as np
from jax.experimental import pallas as pl
from jax.experimental.pallas import tpu as pltpu


# ----------------------------------------------------------------------------
# Fused kernel: graph-guided CLS fusion + classification head + sigmoid
# ----------------------------------------------------------------------------
def fused_forward_kernel(pos_ref, attn0_ref, emb_ref,
                         w1_ref, b1_ref, w2_ref, b2_ref, out_ref):
    pos = pos_ref[...]                                  # (B, 1, L) int32
    attn0 = attn0_ref[...]                              # (B, 1, L) bf16 (attn row 0)
    emb = emb_ref[...]                                  # (B, L, H) bf16

    # In-kernel mask construction (VPU compares, no HBM mask arrays).
    token_mask = (pos >= 2).astype(jnp.float32)         # (B, 1, L)
    node0 = (pos[:, 0, 0:1] == 0).astype(jnp.float32)   # (B, 1)  is CLS a node?

    # Row-0 nodes->token mask.  The `nodes` factor is dropped: when node0 == 0
    # the averaged row is blended away below, so its value is irrelevant.
    m0 = token_mask * attn0.astype(jnp.float32)         # (B, 1, L), entries 0/1
    denom0 = jnp.sum(m0, axis=-1, keepdims=True) + 1e-10
    inv0 = pl.reciprocal(denom0, approx=True)           # EUP slot (effectively free)

    # bf16 MXU batched matvec, fp32 accumulation; normalise AFTER the matmul.
    avg0 = jnp.einsum("bql,blh->bqh", m0.astype(jnp.bfloat16), emb,
                      preferred_element_type=jnp.float32)           # (B, 1, H)
    avg0 = (avg0 * inv0)[:, 0, :]                                   # (B, H)

    # emb * (~nodes_mask) + avg * nodes_mask, CLS row only, blended in f32.
    cls0 = emb[:, 0, :].astype(jnp.float32)                         # (B, H)
    cls = cls0 * (1.0 - node0) + avg0 * node0                       # (B, H)

    # TODO(synk): encoder.roberta(...) is external; identity here.

    # RobertaClassificationHead: dense -> tanh -> out_proj (dropout = identity).
    h = jnp.tanh(jnp.dot(cls.astype(jnp.bfloat16), w1_ref[...],
                         preferred_element_type=jnp.float32)
                 + b1_ref[...])                                     # (B, H) f32
    logits = (jnp.dot(h.astype(jnp.bfloat16), w2_ref[...],
                      preferred_element_type=jnp.float32)
              + b2_ref[...])                                        # (B, 128) lane-dense
    out_ref[...] = jax.nn.sigmoid(logits)


def _resident_spec(block_shape, index_map):
    """Constant-index weight/bias spec: single-buffered when the running JAX
    supports pipeline_mode (their block index never changes, so the second
    buffer would be pure VMEM waste)."""
    buffered = getattr(pl, "Buffered", None)
    if buffered is not None:
        try:
            return pl.BlockSpec(block_shape, index_map, pipeline_mode=buffered(1))
        except TypeError:
            pass
    return pl.BlockSpec(block_shape, index_map)


def _pick_batch_block(bs, L, H, vmem_budget_bytes=24 * 1024 * 1024):
    """Batch-block size: as large as the (double-buffered, bf16) emb stream
    budget allows.  24 MiB keeps the working set well under v7x's 64 MiB
    physical / 32 MiB default-scoped VMEM while still being generous on
    v5e/v6e.  Also keep >=2 grid steps when the batch allows so v7x's second
    TensorCore gets work.  Always a multiple of 8 (sublane-dense output)."""
    per_elem = 2 * 2 * L * H                      # 2 buffers x bf16 emb row-block
    B = max(8, (vmem_budget_bytes // per_elem) // 8 * 8)
    bs_pad8 = pl.cdiv(bs, 8) * 8
    B = min(B, max(8, (bs_pad8 // 2) // 8 * 8))   # grid >= 2 when bs >= 16
    return max(8, B)


def fused_forward(pos3, attn_row0, emb, w1, b1, w2p, b2p, *, batch_block):
    bs_pad, L, H = emb.shape
    n_pad = w2p.shape[1]
    B = batch_block
    assert bs_pad % B == 0 and B % 8 == 0

    grid_spec = pltpu.PrefetchScalarGridSpec(
        num_scalar_prefetch=0,
        grid=(bs_pad // B,),
        in_specs=[
            pl.BlockSpec((B, 1, L), lambda b: (b, 0, 0)),   # position_idx (int32)
            pl.BlockSpec((B, 1, L), lambda b: (b, 0, 0)),   # attn row 0 (bf16)
            pl.BlockSpec((B, L, H), lambda b: (b, 0, 0)),   # word embeddings (bf16)
            _resident_spec((H, H),     lambda b: (0, 0)),   # dense W   (bf16, resident)
            _resident_spec((1, H),     lambda b: (0, 0)),   # dense b   (f32, resident)
            _resident_spec((H, n_pad), lambda b: (0, 0)),   # out_proj W (bf16, padded)
            _resident_spec((1, n_pad), lambda b: (0, 0)),   # out_proj b (f32, padded)
        ],
        out_specs=pl.BlockSpec((B, n_pad), lambda b: (b, 0)),
    )

    cost = pl.CostEstimate(
        flops=int(2 * bs_pad * (L * H + H * H + H * n_pad)),
        transcendentals=int(bs_pad * (H + n_pad + 1)),
        bytes_accessed=int(
            emb.size * emb.dtype.itemsize
            + pos3.size * pos3.dtype.itemsize
            + attn_row0.size * attn_row0.dtype.itemsize
            + w1.size * w1.dtype.itemsize + b1.size * b1.dtype.itemsize
            + w2p.size * w2p.dtype.itemsize + b2p.size * b2p.dtype.itemsize
            + bs_pad * n_pad * 4),
    )

    return pl.pallas_call(
        fused_forward_kernel,
        out_shape=jax.ShapeDtypeStruct((bs_pad, n_pad), jnp.float32),
        grid_spec=grid_spec,
        compiler_params=pltpu.CompilerParams(
            dimension_semantics=("parallel",),
            vmem_limit_bytes=48 * 1024 * 1024),
        cost_estimate=cost,
    )(pos3, attn_row0, emb, w1, b1, w2p, b2p)


# ----------------------------------------------------------------------------
# Init-time weight prep (hoisted out of the per-call path per the review)
# ----------------------------------------------------------------------------
def prepare_params(raw):
    n_cls = raw["w2"].shape[1]
    n_pad = pl.cdiv(n_cls, 128) * 128
    prepped = {
        "word_emb": raw["word_emb"].astype(jnp.bfloat16),   # bf16 halves emb DMA bytes
        "w1": raw["w1"].astype(jnp.bfloat16),
        "b1": raw["b1"].astype(jnp.float32),
        "w2p": jnp.pad(raw["w2"], ((0, 0), (0, n_pad - n_cls))).astype(jnp.bfloat16),
        "b2p": jnp.pad(raw["b2"], ((0, 0), (0, n_pad - n_cls))).astype(jnp.float32),
    }
    return prepped, n_cls


# ----------------------------------------------------------------------------
# Full forward (labels=None path -> returns prob)
# ----------------------------------------------------------------------------
def _model_forward_impl(prepped, inputs_ids, position_idx, attn_mask,
                        *, n_cls, batch_block=None):
    bs, L = inputs_ids.shape
    H = prepped["word_emb"].shape[1]
    if batch_block is None:
        batch_block = _pick_batch_block(bs, L, H)
    B = batch_block
    bs_pad = pl.cdiv(bs, B) * B
    pad_b = bs_pad - bs

    ids = inputs_ids.astype(jnp.int32)
    pos = position_idx.astype(jnp.int32)
    # Only attn row 0 feeds the CLS row (identity encoder); ship it in bf16
    # (values are exactly 0/1, so the cast is lossless).
    attn_row0 = attn_mask[:, 0:1, :].astype(jnp.bfloat16)           # (bs, 1, L)

    if pad_b:
        ids = jnp.pad(ids, ((0, pad_b), (0, 0)))
        # padded rows get position 1: neither node (==0) nor token (>=2).
        pos = jnp.pad(pos, ((0, pad_b), (0, 0)), constant_values=1)
        attn_row0 = jnp.pad(attn_row0, ((0, pad_b), (0, 0), (0, 0)))

    # Glue: embedding gather (bf16 table -> bf16 gathered tensor).
    # TODO(synk): could be fused into the kernel via scalar-prefetched ids +
    # pl.Element row indexing if the gather ever shows up in profiles.
    emb = jnp.take(prepped["word_emb"], ids, axis=0)                # (bs_pad, L, H)
    pos3 = pos.reshape(bs_pad, 1, L)

    out = fused_forward(pos3, attn_row0, emb,
                        prepped["w1"], prepped["b1"],
                        prepped["w2p"], prepped["b2p"],
                        batch_block=B)                              # (bs_pad, n_pad)
    return out[:bs, :n_cls]


model_forward = jax.jit(_model_forward_impl, static_argnames=("n_cls", "batch_block"))


# ----------------------------------------------------------------------------
# Pure-JAX fp32 reference (full-fidelity: full mask, full fuse, CLS slice)
# ----------------------------------------------------------------------------
def reference_forward(params, inputs_ids, position_idx, attn_mask):
    emb = jnp.take(params["word_emb"], inputs_ids, axis=0)
    nodes = (position_idx == 0).astype(jnp.float32)
    tokens = (position_idx >= 2).astype(jnp.float32)
    m = nodes[:, :, None] * tokens[:, None, :] * attn_mask.astype(jnp.float32)
    m = m / (m.sum(-1) + 1e-10)[:, :, None]
    avg = jnp.einsum("abc,acd->abd", m, emb)
    fused = emb * (1.0 - nodes)[:, :, None] + avg * nodes[:, :, None]
    cls = fused[:, 0, :]
    h = jnp.tanh(cls @ params["w1"] + params["b1"])
    logits = h @ params["w2"] + params["b2"]
    return jax.nn.sigmoid(logits)


if __name__ == "__main__":
    bs, L, H, vocab, n_cls = 16, 16, 128, 64, 10

    key = jax.random.PRNGKey(0)
    ks = jax.random.split(key, 8)
    raw = {
        "word_emb": 0.02 * jax.random.normal(ks[0], (vocab, H), jnp.float32),
        "w1": 0.05 * jax.random.normal(ks[1], (H, H), jnp.float32),
        "b1": 0.01 * jax.random.normal(ks[2], (1, H), jnp.float32),
        "w2": 0.05 * jax.random.normal(ks[3], (H, n_cls), jnp.float32),
        "b2": 0.01 * jax.random.normal(ks[4], (1, n_cls), jnp.float32),
    }

    inputs_ids = jax.random.randint(ks[5], (bs, L), 0, vocab, dtype=jnp.int32)
    position_idx = jax.random.randint(ks[6], (bs, L), 0, 5, dtype=jnp.int32)
    # Exercise both blend branches deterministically: even batch elements have
    # a node at CLS (pos==0), odd ones do not.
    cls_is_node = (jnp.arange(bs) % 2 == 0)
    position_idx = position_idx.at[:, 0].set(jnp.where(cls_is_node, 0, 1))
    # Edge case (review concern): CLS is a node but no tokens exist at all, so
    # the 1e-10-protected denominator / approx-reciprocal path is exercised.
    position_idx = position_idx.at[2, :].set(1)
    position_idx = position_idx.at[2, 0].set(0)
    attn_mask = jax.random.bernoulli(ks[7], 0.7, (bs, L, L))        # bool {0,1}

    prepped, ncls = prepare_params(raw)

    prob = jax.block_until_ready(
        model_forward(prepped, inputs_ids, position_idx, attn_mask, n_cls=ncls))
    ref = jax.block_until_ready(
        reference_forward(raw, inputs_ids, position_idx, attn_mask))

    # Tolerance covers bf16 embeddings/weights/activations on the MXU and the
    # EUP approx reciprocal (fp32 reference); structural errors would be
    # orders of magnitude larger.
    np.testing.assert_allclose(np.asarray(prob), np.asarray(ref),
                               rtol=5e-3, atol=5e-4)
    assert prob.shape == (bs, n_cls)
    print("KERNEL_OK")
</pallas_src>

<mosaic_0001>
module attributes {stable_mosaic.version = 11 : i64} {
  func.func @fused_forward_kernel(%arg0: i32, %arg1: memref<8x1x16xi32, #tpu.memory_space<vmem>>, %arg2: memref<8x1x16xbf16, #tpu.memory_space<vmem>>, %arg3: memref<8x16x128xbf16, #tpu.memory_space<vmem>>, %arg4: memref<128x128xbf16, #tpu.memory_space<vmem>>, %arg5: memref<1x128xf32, #tpu.memory_space<vmem>>, %arg6: memref<128x128xbf16, #tpu.memory_space<vmem>>, %arg7: memref<1x128xf32, #tpu.memory_space<vmem>>, %arg8: memref<8x128xf32, #tpu.memory_space<vmem>>) attributes {dimension_semantics = [#tpu.dimension_semantics<parallel>], iteration_bounds = array<i64: 2>, scalar_prefetch = 0 : i64, scratch_operands = 0 : i64, tpu.core_type = #tpu.core_type<tc>, window_params = [{transform_indices = @transform_0, window_bounds = array<i64: 8, 1, 16>}, {transform_indices = @transform_1, window_bounds = array<i64: 8, 1, 16>}, {transform_indices = @transform_2, window_bounds = array<i64: 8, 16, 128>}, {pipeline_mode = #tpu.pipeline_mode<synchronous>, transform_indices = @transform_3, window_bounds = array<i64: 128, 128>}, {pipeline_mode = #tpu.pipeline_mode<synchronous>, transform_indices = @transform_4, window_bounds = array<i64: 1, 128>}, {pipeline_mode = #tpu.pipeline_mode<synchronous>, transform_indices = @transform_5, window_bounds = array<i64: 128, 128>}, {pipeline_mode = #tpu.pipeline_mode<synchronous>, transform_indices = @transform_6, window_bounds = array<i64: 1, 128>}, {transform_indices = @transform_7, window_bounds = array<i64: 8, 128>}]} {
    %c0 = arith.constant 0 : index
    %c0_0 = arith.constant 0 : index
    %c0_1 = arith.constant 0 : index
    %0 = vector.load %arg1[%c0, %c0_0, %c0_1] : memref<8x1x16xi32, #tpu.memory_space<vmem>>, vector<8x1x16xi32>
    %c0_2 = arith.constant 0 : index
    %c0_3 = arith.constant 0 : index
    %c0_4 = arith.constant 0 : index
    %1 = vector.load %arg2[%c0_2, %c0_3, %c0_4] : memref<8x1x16xbf16, #tpu.memory_space<vmem>>, vector<8x1x16xbf16>
    %c0_5 = arith.constant 0 : index
    %c0_6 = arith.constant 0 : index
    %c0_7 = arith.constant 0 : index
    %2 = vector.load %arg3[%c0_5, %c0_6, %c0_7] : memref<8x16x128xbf16, #tpu.memory_space<vmem>>, vector<8x16x128xbf16>
    %c2_i32 = arith.constant 2 : i32
    %3 = vector.broadcast %c2_i32 : i32 to vector<8x1x16xi32>
    %4 = arith.cmpi sge, %0, %3 : vector<8x1x16xi32>
    %5 = arith.extui %4 : vector<8x1x16xi1> to vector<8x1x16xi32>
    %6 = arith.sitofp %5 : vector<8x1x16xi32> to vector<8x1x16xf32>
    %7 = vector.extract_strided_slice %0 {offsets = [0, 0, 0], sizes = [8, 1, 1], strides = [1, 1, 1]} : vector<8x1x16xi32> to vector<8x1x1xi32>
    %8 = vector.shape_cast %7 : vector<8x1x1xi32> to vector<8x1xi32>
    %c0_i32 = arith.constant 0 : i32
    %9 = vector.broadcast %c0_i32 : i32 to vector<8x1xi32>
    %10 = arith.cmpi eq, %8, %9 : vector<8x1xi32>
    %11 = arith.extui %10 : vector<8x1xi1> to vector<8x1xi32>
    %12 = arith.sitofp %11 : vector<8x1xi32> to vector<8x1xf32>
    %13 = arith.extf %1 : vector<8x1x16xbf16> to vector<8x1x16xf32>
    %14 = arith.mulf %6, %13 : vector<8x1x16xf32>
    %cst = arith.constant dense<0.000000e+00> : vector<8x1xf32>
    %15 = vector.multi_reduction <add>, %14, %cst [2] : vector<8x1x16xf32> to vector<8x1xf32>
    %16 = vector.shape_cast %15 : vector<8x1xf32> to vector<8x1x1xf32>
    %cst_8 = arith.constant 1.000000e-10 : f32
    %17 = vector.broadcast %cst_8 : f32 to vector<8x1x1xf32>
    %18 = arith.addf %16, %17 : vector<8x1x1xf32>
    %19 = tpu.reciprocal %18 {approx = true} : vector<8x1x1xf32> -> vector<8x1x1xf32>
    %20 = arith.truncf %14 : vector<8x1x16xf32> to vector<8x1x16xbf16>
    "tpu.trace_start"() <{level = 10 : i32, message = "bql,blh->bqh"}> : () -> ()
    %cst_9 = arith.constant dense<0.000000e+00> : vector<8x1x128xf32>
    %21 = tpu.matmul %20, %2, %cst_9 {dimension_numbers = #tpu.dot_dimension_numbers<[2], [1], [1], [2], [0, 0, 0, 1, 1, 2], [0], [0]>} : vector<8x1x16xbf16>, vector<8x16x128xbf16>, vector<8x1x128xf32> -> vector<8x1x128xf32>
    "tpu.trace_stop"() : () -> ()
    %22 = vector.broadcast %19 : vector<8x1x1xf32> to vector<8x1x128xf32>
    %23 = arith.mulf %21, %22 : vector<8x1x128xf32>
    %24 = vector.shape_cast %23 : vector<8x1x128xf32> to vector<8x128xf32>
    %25 = vector.extract_strided_slice %2 {offsets = [0, 0, 0], sizes = [8, 1, 128], strides = [1, 1, 1]} : vector<8x16x128xbf16> to vector<8x1x128xbf16>
    %26 = vector.shape_cast %25 : vector<8x1x128xbf16> to vector<8x128xbf16>
    %27 = arith.extf %26 : vector<8x128xbf16> to vector<8x128xf32>
    %cst_10 = arith.constant 1.000000e+00 : f32
    %28 = vector.broadcast %cst_10 : f32 to vector<8x1xf32>
    %29 = arith.subf %28, %12 : vector<8x1xf32>
    %30 = vector.broadcast %29 : vector<8x1xf32> to vector<8x128xf32>
    %31 = arith.mulf %27, %30 : vector<8x128xf32>
    %32 = vector.broadcast %12 : vector<8x1xf32> to vector<8x128xf32>
    %33 = arith.mulf %24, %32 : vector<8x128xf32>
    %34 = arith.addf %31, %33 : vector<8x128xf32>
    %35 = arith.truncf %34 : vector<8x128xf32> to vector<8x128xbf16>
    %c0_11 = arith.constant 0 : index
    %c0_12 = arith.constant 0 : index
    %36 = vector.load %arg4[%c0_11, %c0_12] : memref<128x128xbf16, #tpu.memory_space<vmem>>, vector<128x128xbf16>
    %cst_13 = arith.constant dense<0.000000e+00> : vector<8x128xf32>
    %37 = tpu.matmul %35, %36, %cst_13 {dimension_numbers = #tpu.dot_dimension_numbers<[1], [0], [0], [1], [0, 0, 1, 1], [], []>} : vector<8x128xbf16>, vector<128x128xbf16>, vector<8x128xf32> -> vector<8x128xf32>
    %c0_14 = arith.constant 0 : index
    %c0_15 = arith.constant 0 : index
    %38 = vector.load %arg5[%c0_14, %c0_15] : memref<1x128xf32, #tpu.memory_space<vmem>>, vector<1x128xf32>
    %39 = vector.broadcast %38 : vector<1x128xf32> to vector<8x128xf32>
    %40 = arith.addf %37, %39 : vector<8x128xf32>
    %41 = math.tanh %40 : vector<8x128xf32>
    %42 = arith.truncf %41 : vector<8x128xf32> to vector<8x128xbf16>
    %c0_16 = arith.constant 0 : index
    %c0_17 = arith.constant 0 : index
    %43 = vector.load %arg6[%c0_16, %c0_17] : memref<128x128xbf16, #tpu.memory_space<vmem>>, vector<128x128xbf16>
    %cst_18 = arith.constant dense<0.000000e+00> : vector<8x128xf32>
    %44 = tpu.matmul %42, %43, %cst_18 {dimension_numbers = #tpu.dot_dimension_numbers<[1], [0], [0], [1], [0, 0, 1, 1], [], []>} : vector<8x128xbf16>, vector<128x128xbf16>, vector<8x128xf32> -> vector<8x128xf32>
    %c0_19 = arith.constant 0 : index
    %c0_20 = arith.constant 0 : index
    %45 = vector.load %arg7[%c0_19, %c0_20] : memref<1x128xf32, #tpu.memory_space<vmem>>, vector<1x128xf32>
    %46 = vector.broadcast %45 : vector<1x128xf32> to vector<8x128xf32>
    %47 = arith.addf %44, %46 : vector<8x128xf32>
    %48 = arith.negf %47 : vector<8x128xf32>
    %49 = math.exp %48 : vector<8x128xf32>
    %cst_21 = arith.constant 1.000000e+00 : f32
    %50 = vector.broadcast %cst_21 : f32 to vector<8x128xf32>
    %51 = arith.addf %50, %49 : vector<8x128xf32>
    %52 = arith.divf %50, %51 : vector<8x128xf32>
    %c0_22 = arith.constant 0 : index
    %c0_23 = arith.constant 0 : index
    %53 = vector.load %arg8[%c0_22, %c0_23] : memref<8x128xf32, #tpu.memory_space<vmem>>, vector<8x128xf32>
    tpu.vector_store %arg8[%c0_22, %c0_23], %52 {strides = array<i32>} : memref<8x128xf32, #tpu.memory_space<vmem>>, vector<8x128xf32>,
    return
  }
  func.func @transform_0(%arg0: i32) -> (i32, i32, i32) {
    %c0_i32 = arith.constant 0 : i32
    %c0_i32_0 = arith.constant 0 : i32
    %c0_i32_1 = arith.constant 0 : i32
    return %arg0, %c0_i32, %c0_i32_0 : i32, i32, i32
  }
  func.func @transform_1(%arg0: i32) -> (i32, i32, i32) {
    %c0_i32 = arith.constant 0 : i32
    %c0_i32_0 = arith.constant 0 : i32
    %c0_i32_1 = arith.constant 0 : i32
    return %arg0, %c0_i32, %c0_i32_0 : i32, i32, i32
  }
  func.func @transform_2(%arg0: i32) -> (i32, i32, i32) {
    %c0_i32 = arith.constant 0 : i32
    %c0_i32_0 = arith.constant 0 : i32
    %c0_i32_1 = arith.constant 0 : i32
    return %arg0, %c0_i32, %c0_i32_0 : i32, i32, i32
  }
  func.func @transform_3(%arg0: i32) -> (i32, i32) {
    %c0_i32 = arith.constant 0 : i32
    %c0_i32_0 = arith.constant 0 : i32
    %c0_i32_1 = arith.constant 0 : i32
    return %c0_i32, %c0_i32_0 : i32, i32
  }
  func.func @transform_4(%arg0: i32) -> (i32, i32) {
    %c0_i32 = arith.constant 0 : i32
    %c0_i32_0 = arith.constant 0 : i32
    %c0_i32_1 = arith.constant 0 : i32
    return %c0_i32, %c0_i32_0 : i32, i32
  }
  func.func @transform_5(%arg0: i32) -> (i32, i32) {
    %c0_i32 = arith.constant 0 : i32
    %c0_i32_0 = arith.constant 0 : i32
    %c0_i32_1 = arith.constant 0 : i32
    return %c0_i32, %c0_i32_0 : i32, i32
  }
  func.func @transform_6(%arg0: i32) -> (i32, i32) {
    %c0_i32 = arith.constant 0 : i32
    %c0_i32_0 = arith.constant 0 : i32
    %c0_i32_1 = arith.constant 0 : i32
    return %c0_i32, %c0_i32_0 : i32, i32
  }
  func.func @transform_7(%arg0: i32) -> (i32, i32) {
    %c0_i32 = arith.constant 0 : i32
    %c0_i32_0 = arith.constant 0 : i32
    return %arg0, %c0_i32 : i32, i32
  }
}

</mosaic_0001>

<bundles_post_ra>
// kernel: _model_forward_impl.1
= control target key start
LH: loop header
LB: loop body
LE: loop exit
PB: predicated region body
PF: predicated region fallthrough
CT: control target
= control target key end

     0   :  { %12 = vsyncpa [#allocation3], 0  ;;  %s2186_s0 = inlined_call_operand.vmem [shape: s32[16,1,16], index: 0, kind: input, shape index: {}]   ;;  %s2187_s1 = inlined_call_operand.vmem [shape: bf16[16,1,16], index: 1, kind: input, shape index: {}]   ;;  %s2188_s2 = inlined_call_operand.vmem [shape: bf16[16,16,128], index: 2, kind: input, shape index: {}]   ;;  %s2189_s3 = inlined_call_operand.vmem [shape: bf16[128,128], index: 3, kind: input, shape index: {}]   ;;  %s2190_s4 = inlined_call_operand.vmem [shape: f32[1,128], index: 4, kind: input, shape index: {}]   ;;  %s2191_s5 = inlined_call_operand.vmem [shape: bf16[128,128], index: 5, kind: input, shape index: {}]   ;;  %s2192_s6 = inlined_call_operand.vmem [shape: f32[1,128], index: 6, kind: input, shape index: {}]   ;;  %s2193_s7 = inlined_call_operand.hbm [shape: f32[16,128], index: 7, kind: output, shape index: {}]  }
   0x1   :  { %14 = vsyncpa [#allocation3 + $0x1], 0  ;;  %s1832_s24 = smov 0   ;;  %s1834_s25 = smov 0  }
   0x2   :  { %s1836_s26 = smov 0   ;;  %s1838_s27 = smov 0  }
   0x3 LB: > { %s1853_s28 = sadd.s32 4294967295, %s1786_s27   ;;  %s1420_s29 = sadd.s32 4294967294, %s1786_s27   ;;  %s1786_s27 = sphi %s1838_s27, %s2199_s27   ;;  %s1782_s26 = sphi %s1836_s26, %s2198_s26   ;;  %s1778_s25 = sphi %s1834_s25, %s2197_s25   ;;  %s1774_s24 = sphi %s1832_s24, %s2196_s24  }
   0x4   : > { %s1857_s30 = sadd.s32 1, %s1786_s27   ;;  %s189_s8 = sadd.s32 1, %s1782_s26 }
   0x5   : > { %s186_s9 = ssub.s32 %s1786_s27, %s1857_s30  ;;  %p199_p0 = scmp.ne.s32.totalorder %s1782_s26, %s1778_s25 }
   0x6   : > { %p187_p1 = scmp.eq.s32.totalorder %s186_s9, 0  ;;  %p200_p2 = scmp.eq.s32.totalorder %s1853_s28, 1 }
   0x7   : > { %p205_p3 = scmp.ne.s32.totalorder %s1778_s25, %s1774_s24  ;;  %p206_p4 = scmp.eq.s32.totalorder %s1420_s29, 1 }
   0x8   : > { %s1868_s10 = scalar_select %p187_p1, %s1782_s26, %s189_s8  }
   0x9   : > { %p1870_p5 = por %p200_p2, %p199_p0  ;;  %p1874_p6 = por %p206_p4, %p205_p3 }
   0xa   : > { %p1423_p7 = scmp.ge.s32.totalorder %s1786_s27, 1  ;;  %p262_p8 = scmp.lt.s32.totalorder %s1786_s27, 3 }
   0xc   : > { %p263_p9 = pnand %p1423_p7, %p262_p8 }
   0xd   : > { %s1425_s13 = sshll.u32 (!%p263_p9), %s1853_s28, 3  ;;  %s300_s18 = sand.u32 (!%p263_p9), 1, %s1778_s25  }
   0xe   : > { %266 = sbr.rel (%p263_p9) target bundleno = 714 (0x2ca), region = 48  ;;  %p304_p10 = scmp.lt.s32.totalorder (!%p263_p9), %s1425_s13, 15 }
   0xf   : > { %s1424_s19 = sshll.u32 (!%p263_p9), %s300_s18, 3  ;;  %s1330_s9 = scalar_lea.sflag (!%p263_p9), [#allocation3], %s300_s18 }
  0x10   : > { %s302_s21 = scalar_lea.vmem (!%p263_p9), [#allocation2], %s1424_s19 }
  0x11   : > { %s1343_s22 = sshll.u32 (!%p263_p9), %s302_s21, 4  ;;  %s1344_s22 = int_to_ptr.vmem [resolvable:$true] %s1343_s22 }
  0x13   : > { %v1788_v0 = vmov 0.0   ;;  %vm1789_vm0 = vmmov 0   ;;  %s2201_s13 = smov (!%p304_p10, %s1425_s13), 15  ;;  %v1790_v1 = vmov 0   ;;  %vm417_vm2 = vcmask 122880  }
  0x14   : > { %1520 = vmatprep.subr.bf16.mxu0 %v1788_v0  ;;  %1526 = vmatprep.subr.bf16.mxu1 %v1788_v0  ;;  %s1485_s14 = sshll.u32 %s2201_s13, 3  ;;  %s1890_s17 = scalar_lea.vmem %s2186_s0, %s2201_s13  ;;  %vm472_vm3 = vcmask 130048  }
  0x15   : > { %1522 = vmatprep.mubr.msk.bf16.mxu0 %vm1789_vm0, %v1788_v0  ;;  %1528 = vmatprep.mubr.msk.bf16.mxu1 %vm1789_vm0, %v1788_v0  ;;  %s1895_s20 = scalar_lea.vmem %s2188_s2, %s1485_s14  ;;  %s1900_s23 = scalar_lea.vmem %s2187_s1, %s2201_s13  ;;  %v1903_v2 = vld [vmem:[%s1890_s17] sm:$0x1]  ;;  %v1906_v3 = vld [vmem:[%s1890_s17 + $0x1] sm:$0x1]  ;;  %v1909_v4 = vld [vmem:[%s1890_s17 + $0x3] sm:$0x1] }
  0x16   : > { %1651 = vset.pattern.permute.xlu1 %v1790_v1  ;;  %1650 = vset.pattern.permute.xlu0 %v1790_v1  ;;  %v1912_v5 = vld [vmem:[%s1895_s20] sm:$0xff]   ;;  %v1915_v6 = vld [vmem:[%s1895_s20 + $0x8] sm:$0xff]   ;;  %vm353_vm1 = vcmp.ge.s32.totalorder %v1903_v2, 2  ;;  %v1921_v9 = vld [vmem:[%s1895_s20 + $0x10] sm:$0xff]   ;;  %vm354_vm4 = vcmp.ge.s32.totalorder %v1906_v3, 2  ;;  %vm356_vm5 = vcmp.ge.s32.totalorder %v1909_v4, 2 }
  0x17   : > { %v329_v7 = vld [vmem:[%s1900_s23] sm:$0x1]  ;;  %v330_v8 = vld [vmem:[%s1900_s23 + $0x1] sm:$0x1]  ;;  %v1924_v10 = vld [vmem:[%s1895_s20 + $0x18] sm:$0xff]   ;;  %v1430_v11 = vsel %vm353_vm1, 1.0, %v1788_v0  ;;  %1521 = vmatpush3.bf16.msra.mxu0 %v1912_v5  ;;  %1527 = vmatpush3.bf16.msra.mxu1 %v1915_v6 }
  0x18   : > { %v401_v12 = vunpack.c.l.bf16 %v329_v7  ;;  %v402_v13 = vunpack.c.l.bf16 %v330_v8  ;;  %v332_v14 = vld [vmem:[%s1900_s23 + $0x3] sm:$0x1]  ;;  %v1930_v15 = vld [vmem:[%s1890_s17 + $0x5] sm:$0x1]  ;;  %v1431_v16 = vsel %vm354_vm4, 1.0, %v1788_v0  ;;  %1532 = vmatprep.subr.bf16.mxu0 %v1788_v0  ;;  %1538 = vmatprep.subr.bf16.mxu1 %v1788_v0  ;;  %v1433_v21 = vsel %vm356_vm5, 1.0, %v1788_v0 }
  0x19   : > { %v334_v17 = vld [vmem:[%s1900_s23 + $0x5] sm:$0x1]  ;;  %v1938_v18 = vld [vmem:[%s1890_s17 + $0x2] sm:$0x1]  ;;  %v404_v22 = vunpack.c.l.bf16 %v332_v14  ;;  %vm358_vm6 = vcmp.ge.s32.totalorder %v1930_v15, 2  ;;  %v1966_v40 = vld [vmem:[%s1895_s20 + $0x28] sm:$0xff]  }
  0x1a   : > { %v409_v19 = vmul.f32 %v1430_v11, %v401_v12  ;;  %v410_v20 = vmul.f32 %v1431_v16, %v402_v13  ;;  %v331_v23 = vld [vmem:[%s1900_s23 + $0x2] sm:$0x1]  ;;  %v406_v24 = vunpack.c.l.bf16 %v334_v17  ;;  %vm355_vm7 = vcmp.ge.s32.totalorder %v1938_v18, 2  ;;  %v1948_v30 = vld [vmem:[%s1890_s17 + $0x7] sm:$0x1]  ;;  %v1994_v54 = vld [vmem:[%s1895_s20 + $0x30] sm:$0xff]  }
  0x1b   : > { %v403_v25 = vunpack.c.l.bf16 %v331_v23  ;;  %v412_v29 = vmul.f32 %v1433_v21, %v404_v22  ;;  %v336_v31 = vld [vmem:[%s1900_s23 + $0x7] sm:$0x1]  ;;  %v1435_v32 = vsel %vm358_vm6, 1.0, %v1788_v0  ;;  %v1432_v33 = vsel %vm355_vm7, 1.0, %v1788_v0  ;;  %v1954_v34 = vld [vmem:[%s1890_s17 + $0x4] sm:$0x1] }
  0x1c   : > { %v418_v26 = vsel %vm417_vm2, %v409_v19, 0.0  ;;  %v458_v27 = vpack.c.bf16 %v409_v19, %v409_v19  ;;  %v459_v28 = vpack.c.bf16 %v410_v20, %v410_v20  ;;  %v414_v36 = vmul.f32 %v1435_v32, %v406_v24  ;;  %v1960_v38 = vld [vmem:[%s1895_s20 + $0x20] sm:$0xff]   ;;  %v1997_v55 = vld [vmem:[%s1895_s20 + $0x38] sm:$0xff]   ;;  %v1685_v32 = vld [vmem:[%s2189_s3 + $0x10] sm:$0xff]   ;;  %s1482_s20 = sshll.u32 %s1853_s28, 7  ;;  %s1726_s13 = scalar_lea.vmem %s1344_s22, 128 }
  0x1d   : > { %419 = vadd.xlane.f32.xlu1 %v418_v26  ;;  %v427_v35 = vsel %vm417_vm2, %v412_v29, 0.0  ;;  %v411_v37 = vmul.f32 %v1432_v33, %v403_v25  ;;  %v333_v39 = vld [vmem:[%s1900_s23 + $0x4] sm:$0x1]  ;;  %vm360_vm8 = vcmp.ge.s32.totalorder %v1948_v30, 2  ;;  %v408_v41 = vunpack.c.l.bf16 %v336_v31  ;;  %v1980_v49 = vld [vmem:[%s1890_s17 + $0x6] sm:$0x1]  ;;  %s2151_s8 = scalar_lea.hbm %s2193_s7, %s1482_s20  ;;  %p1727_p11 = scmp.ne.s32.totalorder %s1344_s22, %s1726_s13 }
  0x1e   : > { %1523 = vmatmul.mubr.msk.bf16.vlgmr.msra.gmra.mxu0 %vm472_vm3, %v458_v27  ;;  %1529 = vmatmul.mubr.msk.bf16.vlgmr.msra.gmra.mxu1 %vm472_vm3, %v459_v28  ;;  %v1437_v42 = vsel %vm360_vm8, 1.0, %v1788_v0  ;;  %vm357_vm9 = vcmp.ge.s32.totalorder %v1954_v34, 2  ;;  %v461_v43 = vpack.c.bf16 %v412_v29, %v412_v29  ;;  %v433_v44 = vsel %vm417_vm2, %v414_v36, 0.0  ;;  %v335_v52 = vld [vmem:[%s1900_s23 + $0x6] sm:$0x1]  ;;  %v1680_v27 = vld [vmem:[%s2189_s3 + $0x38] sm:$0xff]  }
  0x1f   : > { %1533 = vmatpush3.bf16.msra.mxu0 %v1921_v9  ;;  %1539 = vmatpush3.bf16.msra.mxu1 %v1924_v10  ;;  %v460_v45 = vpack.c.bf16 %v411_v37, %v411_v37  ;;  %v416_v46 = vmul.f32 %v1437_v42, %v408_v41  ;;  %v405_v47 = vunpack.c.l.bf16 %v333_v39  ;;  %v1434_v48 = vsel %vm357_vm9, 1.0, %v1788_v0  ;;  %v1681_v28 = vld [vmem:[%s2189_s3 + $0x30] sm:$0xff]   ;;  %v1682_v29 = vld [vmem:[%s2189_s3 + $0x28] sm:$0xff]   ;;  %v1684_v31 = vld [vmem:[%s2189_s3 + $0x18] sm:$0xff]   ;;  %p1728_p12 = pnand %p1727_p11, %p1870_p5  ;;  %s1791_s14 = smov [#allocation2]  }
  0x20   : > { %1534 = vmatprep.mubr.msk.bf16.mxu0 %vm1789_vm0, %v1788_v0  ;;  %1540 = vmatprep.mubr.msk.bf16.mxu1 %vm1789_vm0, %v1788_v0  ;;  %v421_v53 = vsel %vm417_vm2, %v410_v20, 0.0  ;;  %vm359_vm10 = vcmp.ge.s32.totalorder %v1980_v49, 2  ;;  %v463_v56 = vpack.c.bf16 %v414_v36, %v414_v36  ;;  %v407_v58 = vunpack.c.l.bf16 %v335_v52  ;;  %v1686_v33 = vld [vmem:[%s2189_s3 + $0x8] sm:$0xff]   ;;  %v1689_v36 = vld [vmem:[%s2191_s5 + $0x30] sm:$0xff]   ;;  %s1730_s15 = sshll.u32 %s1791_s14, 4  ;;  %s1731_s15 = int_to_ptr.vmem [resolvable:$false] %s1730_s15 }
  0x21   : > { %428 = vadd.xlane.f32.xlu1 %v427_v35  ;;  %1544 = vmatprep.subr.bf16.mxu0 %v1788_v0  ;;  %v439_v50 = vsel %vm417_vm2, %v416_v46, 0.0  ;;  %v413_v51 = vmul.f32 %v1434_v48, %v405_v47  ;;  %v1436_v59 = vsel %vm359_vm10, 1.0, %v1788_v0  ;;  %v424_v61 = vsel %vm417_vm2, %v411_v37, 0.0  ;;  %v1688_v35 = vld [vmem:[%s2191_s5 + $0x38] sm:$0xff]   ;;  %v1690_v37 = vld [vmem:[%s2191_s5 + $0x28] sm:$0xff]   ;;  %p1729_p13 = pneg %p1728_p12  ;;  %s1732_s28 = scalar_lea.vmem %s1731_s15, 256 }
  0x22   : > { %1550 = vmatprep.subr.bf16.mxu1 %v1788_v0  ;;  %422 = vadd.xlane.f32.xlu0 %v421_v53  ;;  %v415_v60 = vmul.f32 %v1436_v59, %v407_v58  ;;  %vm378_vm11 = vcmp.eq.s32.totalorder %v1906_v3, 0  ;;  %vm379_vm12 = vcmp.eq.s32.totalorder %v1938_v18, 0  ;;  %v465_v62 = vpack.c.bf16 %v416_v46, %v416_v46  ;;  %p1733_p0 = scmp.lt.s32.totalorder %s1344_s22, %s1731_s15  ;;  %p1734_p1 = scmp.lt.s32.totalorder %s1732_s28, %s1726_s13 }
  0x23   : > { %v462_v57 = vpack.c.bf16 %v413_v51, %v413_v51  ;;  %v430_v1 = vsel %vm417_vm2, %v413_v51, 0.0  ;;  %v1439_v7 = vsel %vm378_vm11, 1.0, %v1788_v0  ;;  %v1440_v8 = vsel %vm379_vm12, 1.0, %v1788_v0 }
  0x24   : > { %v464_v63 = vpack.c.bf16 %v415_v60, %v415_v60  ;;  %v1652_v3 = vpack.i.bf16 %v1440_v8, %v1439_v7  ;;  %v436_v11 = vsel %vm417_vm2, %v415_v60, 0.0  ;;  %vm377_vm13 = vcmp.eq.s32.totalorder %v1903_v2, 0  ;;  %p1735_p2 = por %p1734_p1, %p1733_p0 }
  0x25   : > { %434 = vadd.xlane.f32.xlu1 %v433_v44  ;;  %v877_v12 = vsub.f32 1.0, %v1440_v8  ;;  %v1438_v13 = vsel %vm377_vm13, 1.0, %v1788_v0  ;;  %vm380_vm14 = vcmp.eq.s32.totalorder %v1909_v4, 0  ;;  %vm381_vm15 = vcmp.eq.s32.totalorder %v1954_v34, 0  ;;  %v1687_v34 = vld [vmem:[%s2189_s3] sm:$0xff]  }
  0x26   : > { %1535 = vmatmul.mubr.msk.bf16.vlgmr.msra.gmra.mxu0 %vm472_vm3, %v460_v45  ;;  %1541 = vmatmul.mubr.msk.bf16.vlgmr.msra.gmra.mxu1 %vm472_vm3, %v461_v43  ;;  %v875_v14 = vsub.f32 1.0, %v1438_v13  ;;  %v1441_v16 = vsel %vm380_vm14, 1.0, %v1788_v0  ;;  %v1442_v19 = vsel %vm381_vm15, 1.0, %v1788_v0  ;;  %vm383_vm1 = vcmp.eq.s32.totalorder %v1980_v49, 0  ;;  %p1736_p3 = pnand %p1735_p2, %p1729_p13 }
  0x27   : > { %1545 = vmatpush3.bf16.msra.mxu0 %v1960_v38  ;;  %1551 = vmatpush3.bf16.msra.mxu1 %v1966_v40  ;;  %v878_v17 = vsub.f32 1.0, %v1441_v16  ;;  %v1657_v18 = vpack.i.bf16 %v1441_v16, %v1438_v13  ;;  %v879_v2 = vsub.f32 1.0, %v1442_v19  ;;  %v876_v4 = vsub.f32 1.0, %v1439_v7 }
  0x28   : > { %1546 = vmatprep.mubr.msk.bf16.mxu0 %vm1789_vm0, %v1788_v0  ;;  %1552 = vmatprep.mubr.msk.bf16.mxu1 %vm1789_vm0, %v1788_v0  ;;  %v1444_v22 = vsel %vm383_vm1, 1.0, %v1788_v0  ;;  %vm384_vm2 = vcmp.eq.s32.totalorder %v1948_v30, 0  ;;  %v1683_v30 = vld [vmem:[%s2189_s3 + $0x20] sm:$0xff]   ;;  %v888_v52 = vlaneseq  ;;  %v868_v7 = vunpack.c.l.bf16 %v1915_v6 }
  0x29   : > { %440 = vadd.xlane.f32.xlu1 %v439_v50  ;;  %1556 = vmatprep.subr.bf16.mxu0 %v1788_v0  ;;  %v881_v23 = vsub.f32 1.0, %v1444_v22  ;;  %v1445_v25 = vsel %vm384_vm2, 1.0, %v1788_v0  ;;  %vm1102_vm4 = vcmask 1042434   ;;  %vm1105_vm5 = vcmask 1043459  }
  0x2a   : > { %1562 = vmatprep.subr.bf16.mxu1 %v1788_v0  ;;  %425 = vadd.xlane.f32.xlu0 %v424_v61  ;;  %v1667_v26 = vpack.i.bf16 %v1445_v25, %v1444_v22  ;;  %v889_v59 = vshrl.u32 %v888_v52, 7  ;;  %vm1108_vm6 = vcmask 1044484   ;;  %vm1111_vm7 = vcmask 1045509  }
  0x2b   : > { %vm1114_vm8 = vcmask 1046534   ;;  %vm1117_vm9 = vcmask 1047559  }
  0x2e   : > { %1547 = vmatmul.mubr.msk.bf16.vlgmr.msra.gmra.mxu0 %vm472_vm3, %v462_v57  ;;  %1553 = vmatmul.mubr.msk.bf16.vlgmr.msra.gmra.mxu1 %vm472_vm3, %v463_v56 }
  0x2f   : > { %1557 = vmatpush3.bf16.msra.mxu0 %v1994_v54  ;;  %1563 = vmatpush3.bf16.msra.mxu1 %v1997_v55 }
  0x30   : > { %1558 = vmatprep.mubr.msk.bf16.mxu0 %vm1789_vm0, %v1788_v0  ;;  %1564 = vmatprep.mubr.msk.bf16.mxu1 %vm1789_vm0, %v1788_v0 }
  0x31   : > { %1568 = vmatprep.subr.bf16.mxu0 %v1788_v0  ;;  %1588 = vmatprep.subr.bf16.mxu1 %v1788_v0 }
  0x32   : > { %431 = vadd.xlane.f32.xlu0 %v430_v1 }
  0x36   : > { %1559 = vmatmul.mubr.msk.bf16.vlgmr.msra.gmra.mxu0 %vm472_vm3, %v464_v63  ;;  %1565 = vmatmul.mubr.msk.bf16.vlgmr.msra.gmra.mxu1 %vm472_vm3, %v465_v62  ;;  %v2087_v62 = vsub.s32 0, %v889_v59  ;;  %vm1099_vm3 = vcmask 1041409  }
  0x37   : > { %1584 = vmatprep.mubr.msk.bf16.mxu0 %vm1789_vm0, %v1788_v0  ;;  %1604 = vmatprep.mubr.msk.bf16.mxu1 %vm1789_vm0, %v1788_v0  ;;  %vm382_vm0 = vcmp.eq.s32.totalorder %v1930_v15, 0  ;;  %v882_v15 = vsub.f32 1.0, %v1445_v25 }
  0x38   : > { %437 = vadd.xlane.f32.xlu0 %v436_v11  ;;  %v1443_v20 = vsel %vm382_vm0, 1.0, %v1788_v0  ;;  %1569 = vmatpush3.bf16.msra.mxu0 %v1680_v27 }
  0x39   : > { %v1662_v21 = vpack.i.bf16 %v1443_v20, %v1442_v19  ;;  %v880_v24 = vsub.f32 1.0, %v1443_v20  ;;  %1570 = vmatprep.subr.bf16.mxu0 %v1788_v0  ;;  %1589 = vmatpush3.bf16.msra.mxu1 %v1688_v35 }
  0x3a   : > { %1653 = vperm.xlu1 %1651, %v1652_v3   ;;  %1590 = vmatprep.subr.bf16.mxu1 %v1788_v0 }
  0x3c   : > { %1571 = vmatpush3.bf16.msra.mxu0 %v1681_v28 }
  0x3d   : > { %1572 = vmatprep.subr.bf16.mxu0 %v1788_v0  ;;  %1591 = vmatpush3.bf16.msra.mxu1 %v1689_v36 }
  0x3e   : > { %903 = vperm.xlu1 %1651, %v877_v12   ;;  %1592 = vmatprep.subr.bf16.mxu1 %v1788_v0  ;;  %v867_v12 = vunpack.c.l.bf16 %v1912_v5 }
  0x40   : > { %1573 = vmatpush3.bf16.msra.mxu0 %v1682_v29  ;;  %v869_v29 = vunpack.c.l.bf16 %v1921_v9 }
  0x41   : > { %1574 = vmatprep.subr.bf16.mxu0 %v1788_v0  ;;  %1593 = vmatpush3.bf16.msra.mxu1 %v1690_v37  ;;  %v870_v37 = vunpack.c.l.bf16 %v1924_v10 }
  0x42   : > { %885 = vperm.xlu1 %1651, %v875_v14   ;;  %1594 = vmatprep.subr.bf16.mxu1 %v1788_v0 }
  0x44   : > { %1575 = vmatpush3.bf16.msra.mxu0 %v1683_v30 }
  0x45   : > { %1576 = vmatprep.subr.bf16.mxu0 %v1788_v0 }
  0x46   : > { %912 = vperm.xlu1 %1651, %v878_v17  }
  0x48   : > { %1577 = vmatpush3.bf16.msra.mxu0 %v1684_v31 }
  0x49   : > { %1578 = vmatprep.subr.bf16.mxu0 %v1788_v0 }
  0x4a   : > { %1658 = vperm.xlu1 %1651, %v1657_v18  }
  0x4c   : > { %1579 = vmatpush3.bf16.msra.mxu0 %v1685_v32 }
  0x4d   : > { %1580 = vmatprep.subr.bf16.mxu0 %v1788_v0 }
  0x4e   : > { %921 = vperm.xlu1 %1651, %v879_v2   ;;  %894 = vperm.xlu0 %1650, %v876_v4  }
  0x50   : > { %1581 = vmatpush3.bf16.msra.mxu0 %v1686_v33 }
  0x51   : > { %1582 = vmatprep.subr.bf16.mxu0 %v1788_v0 }
  0x52   : > { %1663 = vperm.xlu1 %1651, %v1662_v21   ;;  %939 = vperm.xlu0 %1650, %v881_v23  }
  0x54   : > { %1583 = vmatpush3.bf16.msra.mxu0 %v1687_v34 }
  0x56   : > { %930 = vperm.xlu1 %1651, %v880_v24   ;;  %948 = vperm.xlu0 %1650, %v882_v15  }
  0x5a   : > { %1668 = vperm.xlu1 %1651, %v1667_v26  }
  0xa6   : > { %v420_v39 = vpop.xlane.xlu1 %419 }
  0xa7   : > { %v442_v51 = vadd.f32 1e-10, %v420_v39 }
  0xaa   : > { %v429_v41 = vpop.xlane.xlu1 %428 }
  0xab   : > { %v423_v45 = vpop.xlane.xlu0 %422  ;;  %v445_v58 = vadd.f32 1e-10, %v429_v41 }
  0xac   : > { %v443_v49 = vadd.f32 1e-10, %v423_v45 }
  0xae   : > { %v435_v42 = vpop.xlane.xlu1 %434  ;;  %1704 = vrcp.f32 %v443_v49 }
  0xaf   : > { %1706 = vrcp.f32 %v442_v51  ;;  %v447_v13 = vadd.f32 1e-10, %v435_v42 }
  0xb2   : > { %v441_v43 = vpop.xlane.xlu1 %440 }
  0xb3   : > { %v426_v47 = vpop.xlane.xlu0 %425  ;;  %v449_v35 = vadd.f32 1e-10, %v441_v43 }
  0xb4   : > { %v444_v57 = vadd.f32 1e-10, %v426_v47 }
  0xb6   : > { %v2081_v44 = vpop.permute.xlu1 %1653  ;;  %1708 = vrcp.f32 %v444_v57 }
  0xb7   : > { %1710 = vrcp.f32 %v445_v58  ;;  %v1655_v63 = vunpack.i.l.bf16 %v2081_v44  ;;  %v1656_v15 = vunpack.i.h.bf16 %v2081_v44 }
  0xb9   : > { %v980_v18 = vrot.slane %v1655_v63, %v2087_v62  ;;  %v989_v9 = vrot.slane %v1656_v15, %v2087_v62 }
  0xba   : > { %v2083_v46 = vpop.permute.xlu1 %903 }
  0xbb   : > { %v432_v50 = vpop.xlane.xlu0 %431  ;;  %v1705_v11 = vpop.eup %1704  ;;  %v909_v36 = vrot.slane %v2083_v46, %v2087_v62 }
  0xbc   : > { %v446_v1 = vadd.f32 1e-10, %v432_v50  ;;  %v1707_v17 = vpop.eup %1706 }
  0xbd   : > { %v957_v10 = vmul.f32 %v909_v36, %v869_v29 }
  0xbe   : > { %v886_v48 = vpop.permute.xlu1 %885  ;;  %1712 = vrcp.f32 %v446_v1 }
  0xbf   : > { %v891_v14 = vrot.slane %v886_v48, %v2087_v62  ;;  %1714 = vrcp.f32 %v447_v13 }
  0xc1   : > { %v438_v56 = vpop.xlane.xlu0 %437  ;;  %v955_v5 = vmul.f32 %v891_v14, %v867_v12 }
  0xc2   : > { %v2085_v53 = vpop.permute.xlu1 %912  ;;  %v448_v26 = vadd.f32 1e-10, %v438_v56 }
  0xc3   : > { %v1709_v34 = vpop.eup %1708  ;;  %v918_v39 = vrot.slane %v2085_v53, %v2087_v62 }
  0xc4   : > { %v1711_v47 = vpop.eup %1710  ;;  %1716 = vrcp.f32 %v448_v26 }
  0xc5   : > { %1718 = vrcp.f32 %v449_v35  ;;  %v958_v52 = vmul.f32 %v918_v39, %v870_v37 }
  0xc6   : > { %v1659_v60 = vpop.permute.xlu1 %1658 }
  0xc7   : > { %v1660_v8 = vunpack.i.l.bf16 %v1659_v60  ;;  %v1661_v30 = vunpack.i.h.bf16 %v1659_v60 }
  0xc9   : > { %v895_v61 = vpop.permute.xlu0 %894  ;;  %v971_v20 = vrot.slane %v1660_v8, %v2087_v62  ;;  %v998_v43 = vrot.slane %v1661_v30, %v2087_v62 }
  0xca   : > { %v900_v3 = vrot.slane %v895_v61, %v2087_v62  ;;  %v2094_v16 = vpop.permute.xlu1 %921 }
  0xcc   : > { %v956_v4 = vmul.f32 %v900_v3, %v868_v7  ;;  %v1713_v3 = vpop.eup %1712 }
  0xcd   : > { %v940_v14 = vpop.permute.xlu0 %939 }
  0xce   : > { %v1664_v31 = vpop.permute.xlu1 %1663 }
  0xcf   : > { %v1666_v63 = vunpack.i.h.bf16 %v1664_v31  ;;  %v1665_v1 = vunpack.i.l.bf16 %v1664_v31 }
  0xd1   : > { %v949_v35 = vpop.permute.xlu0 %948 }
  0xd2   : > { %v931_v57 = vpop.permute.xlu1 %930 }
  0xd6   : > { %v1669_v15 = vpop.permute.xlu1 %1668 }
  0xd7   : > { %v1671_v36 = vunpack.i.h.bf16 %v1669_v15  ;;  %v1670_v37 = vunpack.i.l.bf16 %v1669_v15 }
  0xde   : > { %v559_v19 = vpop.f32.mrf.mxu1  ;;  %v510_v2 = vpop.f32.mrf.mxu0 }
  0xdf   : > { %v860_v6 = vmul.f32 %v1705_v11, %v559_v19  ;;  %v859_v21 = vmul.f32 %v1707_v17, %v510_v2  ;;  %v871_v17 = vunpack.c.l.bf16 %v1960_v38  ;;  %v872_v19 = vunpack.c.l.bf16 %v1966_v40 }
  0xe0   : > { %v1524_v22 = vpop.f32.mrf.mxu0  ;;  %v1530_v23 = vpop.f32.mrf.mxu1  ;;  %v936_v2 = vrot.slane %v931_v57, %v2087_v62  ;;  %v1025_v57 = vrot.slane %v1670_v37, %v2087_v62 }
  0xe1   : > { %v1036_v24 = vmul.f32 %v980_v18, %v860_v6  ;;  %v1035_v25 = vmul.f32 %v971_v20, %v859_v21  ;;  %v927_v18 = vrot.slane %v2094_v16, %v2087_v62  ;;  %v1715_v22 = vpop.eup %1714  ;;  %v1016_v23 = vrot.slane %v1666_v63, %v2087_v62 }
  0xe2   : > { %v513_v27 = vpop.f32.mrf.mxu0  ;;  %v562_v28 = vpop.f32.mrf.mxu1  ;;  %v960_v40 = vmul.f32 %v936_v2, %v872_v19 }
  0xe3   : > { %v1044_v32 = vadd.f32 %v1036_v24, %v956_v4  ;;  %v1043_v33 = vadd.f32 %v1035_v25, %v955_v5  ;;  %v1007_v5 = vrot.slane %v1665_v1, %v2087_v62  ;;  %v959_v28 = vmul.f32 %v927_v18, %v871_v17 }
  0xe4   : > { %v1525_v41 = vpop.f32.mrf.mxu0  ;;  %v1531_v42 = vpop.f32.mrf.mxu1 }
  0xe5   : > { %v1052_v44 = vpack.c.bf16 %v1044_v32, %v1044_v32  ;;  %v1051_v45 = vpack.c.bf16 %v1043_v33, %v1043_v33  ;;  %v1717_v42 = vpop.eup %1716 }
  0xe6   : > { %v608_v48 = vpop.f32.mrf.mxu0  ;;  %v657_v49 = vpop.f32.mrf.mxu1 }
  0xe7   : > { %v1091_v50 = vunpack.c.l.b16 %v1052_v44  ;;  %v861_v51 = vmul.f32 %v1709_v34, %v608_v48  ;;  %v862_v46 = vmul.f32 %v1711_v47, %v657_v49  ;;  %v1090_v59 = vunpack.c.l.b16 %v1051_v45 }
  0xe8   : > { %v1536_v53 = vpop.f32.mrf.mxu0  ;;  %v1542_v56 = vpop.f32.mrf.mxu1  ;;  %v873_v45 = vunpack.c.l.bf16 %v1994_v54  ;;  %v945_v49 = vrot.slane %v940_v14, %v2087_v62 }
  0xe9   : > { %v1098_v58 = vrot.slane %v1091_v50, 7  ;;  %v1037_v60 = vmul.f32 %v989_v9, %v861_v51  ;;  %v1038_v61 = vmul.f32 %v998_v43, %v862_v46  ;;  %v874_v43 = vunpack.c.l.bf16 %v1997_v55 }
  0xea   : > { %v611_v7 = vpop.f32.mrf.mxu0  ;;  %v660_v8 = vpop.f32.mrf.mxu1  ;;  %v954_v50 = vrot.slane %v949_v35, %v2087_v62  ;;  %v1034_v56 = vrot.slane %v1671_v36, %v2087_v62  ;;  %v961_v1 = vmul.f32 %v945_v49, %v873_v45 }
  0xeb   : > { %v1100_v11 = vsel %vm1099_vm3, %v1098_v58, %v1090_v59  ;;  %v1045_v12 = vadd.f32 %v1037_v60, %v957_v10  ;;  %v1046_v13 = vadd.f32 %v1038_v61, %v958_v52  ;;  %v1719_v10 = vpop.eup %1718 }
  0xec   : > { %v1543_v20 = vpop.f32.mrf.mxu1  ;;  %v1537_v6 = vpop.f32.mrf.mxu0  ;;  %v962_v55 = vmul.f32 %v954_v50, %v874_v43 }
  0xed   : > { %v1053_v4 = vpack.c.bf16 %v1045_v12, %v1045_v12  ;;  %v1054_v21 = vpack.c.bf16 %v1046_v13, %v1046_v13 }
  0xee   : > { %v706_v24 = vpop.f32.mrf.mxu0  ;;  %v755_v25 = vpop.f32.mrf.mxu1 }
  0xef   : > { %v1092_v38 = vunpack.c.l.b16 %v1053_v4  ;;  %v1093_v26 = vunpack.c.l.b16 %v1054_v21  ;;  %v863_v27 = vmul.f32 %v1713_v3, %v706_v24  ;;  %v864_v16 = vmul.f32 %v1715_v22, %v755_v25 }
  0xf0   : > { %v1554_v29 = vpop.f32.mrf.mxu1  ;;  %v1548_v30 = vpop.f32.mrf.mxu0 }
  0xf1   : > { %v1101_v31 = vrot.slane %v1092_v38, 6  ;;  %v1104_v32 = vrot.slane %v1093_v26, 5  ;;  %v1039_v33 = vmul.f32 %v1007_v5, %v863_v27  ;;  %v1040_v34 = vmul.f32 %v1016_v23, %v864_v16  ;;  %v1691_v26 = vld [vmem:[%s2191_s5 + $0x20] sm:$0xff]   ;;  %v1692_v27 = vld [vmem:[%s2191_s5 + $0x18] sm:$0xff]   ;;  %v1693_v16 = vld [vmem:[%s2191_s5 + $0x10] sm:$0xff]  }
  0xf2   : > { %v709_v39 = vpop.f32.mrf.mxu0  ;;  %v758_v41 = vpop.f32.mrf.mxu1  ;;  %1595 = vmatpush3.bf16.msra.mxu1 %v1691_v26  ;;  %v1462_v29 = vld [vmem:[%s2190_s4] ss:$0 sm:$0xff] }
  0xf3   : > { %v1103_v44 = vsel %vm1102_vm4, %v1101_v31, %v1100_v11  ;;  %v1047_v47 = vadd.f32 %v1039_v33, %v959_v28  ;;  %v1048_v9 = vadd.f32 %v1040_v34, %v960_v40  ;;  %1596 = vmatprep.subr.bf16.mxu1 %v1788_v0  ;;  %v1694_v28 = vld [vmem:[%s2191_s5 + $0x8] sm:$0xff]   ;;  %v1695_v40 = vld [vmem:[%s2191_s5] sm:$0xff]  }
  0xf4   : > { %v1106_v48 = vsel %vm1105_vm5, %v1104_v32, %v1103_v44  ;;  %v1549_v51 = vpop.f32.mrf.mxu0  ;;  %v1555_v46 = vpop.f32.mrf.mxu1 }
  0xf5   : > { %v1055_v52 = vpack.c.bf16 %v1047_v47, %v1047_v47  ;;  %v1056_v53 = vpack.c.bf16 %v1048_v9, %v1048_v9 }
  0xf6   : > { %v804_v54 = vpop.f32.mrf.mxu0  ;;  %v853_v58 = vpop.f32.mrf.mxu1  ;;  %1597 = vmatpush3.bf16.msra.mxu1 %v1692_v27 }
  0xf7   : > { %v1094_v59 = vunpack.c.l.b16 %v1055_v52  ;;  %v1095_v60 = vunpack.c.l.b16 %v1056_v53  ;;  %v865_v61 = vmul.f32 %v1717_v42, %v804_v54  ;;  %v866_v63 = vmul.f32 %v1719_v10, %v853_v58  ;;  %1598 = vmatprep.subr.bf16.mxu1 %v1788_v0 }
  0xf8   : > { %v1560_v7 = vpop.f32.mrf.mxu0  ;;  %v1566_v8 = vpop.f32.mrf.mxu1 }
  0xf9   : > { %v1107_v3 = vrot.slane %v1094_v59, 4  ;;  %v1110_v11 = vrot.slane %v1095_v60, 3  ;;  %v1041_v12 = vmul.f32 %v1025_v57, %v865_v61  ;;  %v1042_v13 = vmul.f32 %v1034_v56, %v866_v63 }
  0xfa   : > { %v807_v14 = vpop.f32.mrf.mxu0  ;;  %v856_v17 = vpop.f32.mrf.mxu1  ;;  %1599 = vmatpush3.bf16.msra.mxu1 %v1693_v16 }
  0xfb   : > { %v1109_v18 = vsel %vm1108_vm6, %v1107_v3, %v1106_v48  ;;  %v1049_v62 = vadd.f32 %v1041_v12, %v961_v1  ;;  %v1050_v19 = vadd.f32 %v1042_v13, %v962_v55  ;;  %1600 = vmatprep.subr.bf16.mxu1 %v1788_v0 }
  0xfc   : > { %v1112_v2 = vsel %vm1111_vm7, %v1110_v11, %v1109_v18  ;;  %v1561_v20 = vpop.f32.mrf.mxu0  ;;  %v1567_v6 = vpop.f32.mrf.mxu1 }
  0xfd   : > { %v1057_v4 = vpack.c.bf16 %v1049_v62, %v1049_v62  ;;  %v1058_v21 = vpack.c.bf16 %v1050_v19, %v1050_v19 }
  0xfe   : > { %1601 = vmatpush3.bf16.msra.mxu1 %v1694_v28 }
  0xff   : > { %v1096_v22 = vunpack.c.l.b16 %v1057_v4  ;;  %v1097_v23 = vunpack.c.l.b16 %v1058_v21  ;;  %1602 = vmatprep.subr.bf16.mxu1 %v1788_v0  ;;  %v1471_v0 = vld [vmem:[%s2192_s6] ss:$0 sm:$0xff] }
 0x101   : > { %v1113_v5 = vrot.slane %v1096_v22, 2  ;;  %v1116_v24 = vrot.slane %v1097_v23, 1 }
 0x102   : > { %1603 = vmatpush3.bf16.msra.mxu1 %v1695_v40 }
 0x103   : > { %v1115_v25 = vsel %vm1114_vm8, %v1113_v5, %v1112_v2 }
 0x104   : > { %v1118_v15 = vsel %vm1117_vm9, %v1116_v24, %v1115_v25 }
 0x105   : > { %v1119_v38 = vpack.c.b16 %v1118_v15, %v1118_v15 }
 0x107   : > { %1585 = vmatmul.mubr.bf16.vlgmr.msra.gmra.mxu0 %v1119_v38 }
 0x1c7   : > { %v1203_v30 = vpop.f32.mrf.mxu0 }
 0x1c8   : > { %v1204_v31 = vadd.f32 %v1462_v29, %v1203_v30 }
 0x1c9   : > { %v1586_v32 = vpop.f32.mrf.mxu0 }
 0x1ca   : > { %1720 = vtanh.f32 %v1204_v31 }
 0x1cb   : > { %v1206_v33 = vpop.f32.mrf.mxu0 }
 0x1cd   : > { %v1587_v34 = vpop.f32.mrf.mxu0 }
 0x1d7   : > { %v1721_v35 = vpop.eup %1720 }
 0x1d8   : > { %v1210_v36 = vpack.c.bf16 %v1721_v35, %v1721_v35 }
 0x1da   : > { %1605 = vmatmul.mubr.bf16.vlgmr.msra.gmra.mxu1 %v1210_v36 }
 0x29a   : > { %v1316_v37 = vpop.f32.mrf.mxu1 }
 0x29b   : > { %v1317_v39 = vadd.f32 %v1471_v0, %v1316_v37 }
 0x29c   : > { %v1606_v41 = vpop.f32.mrf.mxu1 }
 0x29d   : > { %v1480_v42 = vmul.f32 -1.442695, %v1317_v39 }
 0x29e   : > { %v1319_v44 = vpop.f32.mrf.mxu1 }
 0x29f   : > { %1722 = vpow2.f32 %v1480_v42 }
 0x2a0   : > { %v1607_v45 = vpop.f32.mrf.mxu1 }
 0x2ac   : > { %v1723_v47 = vpop.eup %1722 }
 0x2ad   : > { %v1325_v9 = vadd.f32 1.0, %v1723_v47 }
 0x2af   : > { %1724 = vrcp.f32 %v1325_v9 }
 0x2bc   : > { %v1725_v48 = vpop.eup %1724 }
 0x2bd   : > { %1328 = vst [vmem:[%s302_s21] sm:$0xff] %v1725_v48 }
 0x2be   : > { %1739 = shalt.err (!%p1736_p3)
}
 0x2bf   : > { %s1740_s16 = scalar_lea.hbm %s2151_s8, 128  ;;  %s1744_s19 = scalar_lea.hbm %s2193_s7, 256 }
 0x2c0   : > { %p1741_p4 = scmp.ne.s32.totalorder %s2151_s8, %s1740_s16  ;;  %p1745_p9 = scmp.lt.s32.totalorder %s2151_s8, %s2193_s7 }
 0x2c1   : > { %p1746_p10 = scmp.lt.s32.totalorder %s1744_s19, %s1740_s16 }
 0x2c2   : > { %p1742_p7 = pnand %p1741_p4, %p1870_p5 }
 0x2c3   : > { %p1747_p11 = por %p1746_p10, %p1745_p9 }
 0x2c4   : > { %p1743_p8 = pneg %p1742_p7 }
 0x2c6   : > { %p1748_p12 = pnand %p1747_p11, %p1743_p8 }
 0x2c8   : > { %1751 = shalt.err (!%p1748_p12)
}
 0x2c9   : > { %1608 = dma.vmem_to_hbm [thread:$0]  (%p1870_p5), %s1344_s22, 128, %s2151_s8, %s1330_s9  }
 0x2ca PF: > { %p1614_p13 = scmp.ge.s32.totalorder %s1786_s27, 2  ;;  %s1355_s23 = sand.u32 1, %s1774_s24  }
 0x2cb   : > { %s1356_s29 = scalar_lea.sflag [#allocation3], %s1355_s23 }
 0x2cc   : > { %p1611_p0 = pnand %p1614_p13, %p1874_p6 }
 0x2ce   : > { %p1612_p1 = pneg %p1611_p0 }
 0x2d0   : > { %1769 = dma.done.wait (%p1612_p1), %s1356_s29, 128  }
 0x2d1   : > { %1771 = vsyncadd (%p1612_p1), %s1356_s29, 4294967168  ;;  %p17_p2 = scmp.ge.s32.totalorder %s1857_s30, 4   ;;  %s2196_s24 = smov %s1778_s25 }
 0x2d2   : > { %s2197_s25 = smov %s1782_s26  ;;  %s2198_s26 = smov %s1868_s10 }
 0x2d3   : > { %s2199_s27 = smov %s1857_s30  ;;  %19 = sbr.rel (!%p17_p2) target bundleno = 3 (0x3), region = 89 }
 0x2d8   :  { %1361 = vsyncpa [#allocation3], 1 }
 0x2d9   :  { %1363 = vsyncpa [#allocation3 + $0x1], 1 }

</bundles_post_ra>
